<compile_context>
chip_gen: v7x
topology: tpu7x:2x2x1
jax: 0.10.0
libtpu: 0.0.40
codegen_flags: <defaults>
</compile_context>

<pallas_src>
import jax
import jax.numpy as jnp
from jax import lax
from jax.experimental import pallas as pl
from jax.experimental.pallas import tpu as pltpu

XYZ_DIM, AX_DIM, GR_DIM = 30, 30, 10
OUT_DIM = XYZ_DIM + AX_DIM + GR_DIM        # 70
OUT_PAD = 128                              # lane-dense output slab width


def _round_up(x, m):
    return (x + m - 1) // m * m


# ---------------------------------------------------------------------------
# Kernel: fused 3-branch MLP via packed / block-diagonal weights.
# ---------------------------------------------------------------------------
def _fused_mlp_kernel(x_ref, w1_ref, b1_ref, w2_ref, b2_ref, w3_ref, b3_ref,
                      o_ref):
    x = x_ref[...]                                                   # (TB, in)
    h1 = jnp.dot(x, w1_ref[...], preferred_element_type=jnp.float32) + b1_ref[...]
    h1 = jnp.maximum(h1, 0.0)                                        # (TB, 3H)
    h2 = jnp.dot(h1, w2_ref[...], preferred_element_type=jnp.float32) + b2_ref[...]
    h2 = jnp.maximum(h2, 0.0)                                        # (TB, 3H)
    out = jnp.dot(h2, w3_ref[...], preferred_element_type=jnp.float32) + b3_ref[...]
    # Sigmoid only on gripper columns [60, 70); lane-mask keeps the store
    # lane-dense over the full 128-wide slab.
    col = lax.broadcasted_iota(jnp.int32, out.shape, dimension=1)
    sig_mask = (col >= XYZ_DIM + AX_DIM) & (col < OUT_DIM)
    out = jnp.where(sig_mask, jax.nn.sigmoid(out), out)
    o_ref[...] = out.astype(o_ref.dtype)


# ---------------------------------------------------------------------------
# Parameter init (PyTorch nn.Linear default) and packing.
# ---------------------------------------------------------------------------
def _init_linear(key, fan_in, fan_out):
    kw, kb = jax.random.split(key)
    bound = 1.0 / jnp.sqrt(fan_in)
    w = jax.random.uniform(kw, (fan_in, fan_out), jnp.float32, -bound, bound)
    b = jax.random.uniform(kb, (1, fan_out), jnp.float32, -bound, bound)
    return w, b


def init_mlp_decoder_params(key, input_dim, hidden_dim):
    params = {}
    specs = {"xyz": XYZ_DIM, "axangle": AX_DIM, "gripper": GR_DIM}
    keys = jax.random.split(key, len(specs))
    for k, (name, out_dim) in zip(keys, specs.items()):
        k1, k2, k3 = jax.random.split(k, 3)
        w1, b1 = _init_linear(k1, input_dim, hidden_dim)
        w2, b2 = _init_linear(k2, hidden_dim, hidden_dim)
        w3, b3 = _init_linear(k3, hidden_dim, out_dim)
        params[name] = dict(w1=w1, b1=b1, w2=w2, b2=b2, w3=w3, b3=b3)
    return params


def pack_mlp_decoder_params(params, hidden_dim):
    """Pack 3 branches into one set of weights (block-diag / concat, lane-padded)."""
    H = hidden_dim
    pxyz, pax, pgr = params["xyz"], params["axangle"], params["gripper"]

    w1 = jnp.concatenate([pxyz["w1"], pax["w1"], pgr["w1"]], axis=1)   # (in, 3H)
    b1 = jnp.concatenate([pxyz["b1"], pax["b1"], pgr["b1"]], axis=1)   # (1, 3H)

    w2 = jnp.zeros((3 * H, 3 * H), jnp.float32)                        # block-diag
    w2 = w2.at[0:H, 0:H].set(pxyz["w2"])
    w2 = w2.at[H:2 * H, H:2 * H].set(pax["w2"])
    w2 = w2.at[2 * H:3 * H, 2 * H:3 * H].set(pgr["w2"])
    b2 = jnp.concatenate([pxyz["b2"], pax["b2"], pgr["b2"]], axis=1)   # (1, 3H)

    w3 = jnp.zeros((3 * H, OUT_PAD), jnp.float32)                      # lane-padded
    w3 = w3.at[0:H, 0:XYZ_DIM].set(pxyz["w3"])
    w3 = w3.at[H:2 * H, XYZ_DIM:XYZ_DIM + AX_DIM].set(pax["w3"])
    w3 = w3.at[2 * H:3 * H, XYZ_DIM + AX_DIM:OUT_DIM].set(pgr["w3"])
    b3 = jnp.zeros((1, OUT_PAD), jnp.float32)
    b3 = b3.at[:, 0:XYZ_DIM].set(pxyz["b3"][0])
    b3 = b3.at[:, XYZ_DIM:XYZ_DIM + AX_DIM].set(pax["b3"][0])
    b3 = b3.at[:, XYZ_DIM + AX_DIM:OUT_DIM].set(pgr["b3"][0])

    return dict(w1=w1, b1=b1, w2=w2, b2=b2, w3=w3, b3=b3)


# ---------------------------------------------------------------------------
# Forward: one fused pallas_call, batch padded to a multiple of 8, 1-D batch
# grid marked "parallel".
# ---------------------------------------------------------------------------
def mlp_decoder_forward(packed, image_embed, *, batch_tile=256):
    B, O, D = image_embed.shape
    in_dim = O * D
    x2d = image_embed.reshape(B, in_dim).astype(jnp.float32)

    # Pad batch (sublane dim) to a multiple of 8; choose a batch tile that is a
    # multiple of 8 and divides the padded batch.
    b_pad = _round_up(B, 8)
    tb = min(b_pad, _round_up(batch_tile, 8))
    b_pad = _round_up(b_pad, tb)
    if b_pad != B:
        x2d = jnp.pad(x2d, ((0, b_pad - B), (0, 0)))

    out = pl.pallas_call(
        _fused_mlp_kernel,
        out_shape=jax.ShapeDtypeStruct((b_pad, OUT_PAD), jnp.float32),
        grid=(b_pad // tb,),
        in_specs=[
            pl.BlockSpec((tb, in_dim), lambda i: (i, 0)),
            pl.BlockSpec(packed["w1"].shape, lambda i: (0, 0)),
            pl.BlockSpec(packed["b1"].shape, lambda i: (0, 0)),
            pl.BlockSpec(packed["w2"].shape, lambda i: (0, 0)),
            pl.BlockSpec(packed["b2"].shape, lambda i: (0, 0)),
            pl.BlockSpec(packed["w3"].shape, lambda i: (0, 0)),
            pl.BlockSpec(packed["b3"].shape, lambda i: (0, 0)),
        ],
        out_specs=pl.BlockSpec((tb, OUT_PAD), lambda i: (i, 0)),
        compiler_params=pltpu.CompilerParams(
            dimension_semantics=("parallel",)),
    )(x2d, packed["w1"], packed["b1"], packed["w2"], packed["b2"],
      packed["w3"], packed["b3"])

    xyz = out[:B, 0:XYZ_DIM].reshape(-1, 10, 3)
    axangle = out[:B, XYZ_DIM:XYZ_DIM + AX_DIM].reshape(-1, 10, 3)
    gripper = out[:B, XYZ_DIM + AX_DIM:OUT_DIM].reshape(-1, 10, 1)
    return xyz, axangle, gripper


# ---------------------------------------------------------------------------
# Pure-JAX reference (unpacked per-branch weights).
# ---------------------------------------------------------------------------
def _reference_forward(params, image_embed):
    B, O, D = image_embed.shape
    x = image_embed.reshape(B, O * D)

    def branch(p, sig):
        h = jnp.maximum(x @ p["w1"] + p["b1"], 0.0)
        h = jnp.maximum(h @ p["w2"] + p["b2"], 0.0)
        o = h @ p["w3"] + p["b3"]
        return jax.nn.sigmoid(o) if sig else o

    return (branch(params["xyz"], False).reshape(-1, 10, 3),
            branch(params["axangle"], False).reshape(-1, 10, 3),
            branch(params["gripper"], True).reshape(-1, 10, 1))


if __name__ == "__main__":
    key = jax.random.PRNGKey(0)
    k_param, k_x = jax.random.split(key)

    B, O, D = 2, 4, 16            # input_dim = O * D = 64
    hidden_dim = 32
    input_dim = O * D

    params = init_mlp_decoder_params(k_param, input_dim, hidden_dim)
    packed = pack_mlp_decoder_params(params, hidden_dim)
    image_embed = jax.random.normal(k_x, (B, O, D), jnp.float32)

    xyz, axangle, gripper = jax.block_until_ready(
        mlp_decoder_forward(packed, image_embed))

    # Sanity check against pure-JAX reference.
    r_xyz, r_ax, r_gr = _reference_forward(params, image_embed)
    assert xyz.shape == (B, 10, 3)
    assert axangle.shape == (B, 10, 3)
    assert gripper.shape == (B, 10, 1)
    assert jnp.allclose(xyz, r_xyz, atol=1e-5)
    assert jnp.allclose(axangle, r_ax, atol=1e-5)
    assert jnp.allclose(gripper, r_gr, atol=1e-5)

    print("KERNEL_OK")
</pallas_src>

<mosaic_0001>
module attributes {stable_mosaic.version = 11 : i64} {
  func.func @_fused_mlp_kernel(%arg0: i32, %arg1: memref<8x64xf32, #tpu.memory_space<vmem>>, %arg2: memref<64x96xf32, #tpu.memory_space<vmem>>, %arg3: memref<1x96xf32, #tpu.memory_space<vmem>>, %arg4: memref<96x96xf32, #tpu.memory_space<vmem>>, %arg5: memref<1x96xf32, #tpu.memory_space<vmem>>, %arg6: memref<96x128xf32, #tpu.memory_space<vmem>>, %arg7: memref<1x128xf32, #tpu.memory_space<vmem>>, %arg8: memref<8x128xf32, #tpu.memory_space<vmem>>) attributes {dimension_semantics = [#tpu.dimension_semantics<parallel>], iteration_bounds = array<i64: 1>, scalar_prefetch = 0 : i64, scratch_operands = 0 : i64, tpu.core_type = #tpu.core_type<tc>, window_params = [{transform_indices = @transform_0, window_bounds = array<i64: 8, 64>}, {pipeline_mode = #tpu.pipeline_mode<synchronous>, transform_indices = @transform_1, window_bounds = array<i64: 64, 96>}, {pipeline_mode = #tpu.pipeline_mode<synchronous>, transform_indices = @transform_2, window_bounds = array<i64: 1, 96>}, {pipeline_mode = #tpu.pipeline_mode<synchronous>, transform_indices = @transform_3, window_bounds = array<i64: 96, 96>}, {pipeline_mode = #tpu.pipeline_mode<synchronous>, transform_indices = @transform_4, window_bounds = array<i64: 1, 96>}, {pipeline_mode = #tpu.pipeline_mode<synchronous>, transform_indices = @transform_5, window_bounds = array<i64: 96, 128>}, {pipeline_mode = #tpu.pipeline_mode<synchronous>, transform_indices = @transform_6, window_bounds = array<i64: 1, 128>}, {transform_indices = @transform_7, window_bounds = array<i64: 8, 128>}]} {
    %c0 = arith.constant 0 : index
    %c0_0 = arith.constant 0 : index
    %0 = vector.load %arg1[%c0, %c0_0] : memref<8x64xf32, #tpu.memory_space<vmem>>, vector<8x64xf32>
    %c0_1 = arith.constant 0 : index
    %c0_2 = arith.constant 0 : index
    %1 = vector.load %arg2[%c0_1, %c0_2] : memref<64x96xf32, #tpu.memory_space<vmem>>, vector<64x96xf32>
    %cst = arith.constant dense<0.000000e+00> : vector<8x96xf32>
    %2 = tpu.matmul %0, %1, %cst {dimension_numbers = #tpu.dot_dimension_numbers<[1], [0], [0], [1], [0, 0, 1, 1], [], []>} : vector<8x64xf32>, vector<64x96xf32>, vector<8x96xf32> -> vector<8x96xf32>
    %c0_3 = arith.constant 0 : index
    %c0_4 = arith.constant 0 : index
    %3 = vector.load %arg3[%c0_3, %c0_4] : memref<1x96xf32, #tpu.memory_space<vmem>>, vector<1x96xf32>
    %4 = vector.broadcast %3 : vector<1x96xf32> to vector<8x96xf32>
    %5 = arith.addf %2, %4 : vector<8x96xf32>
    %cst_5 = arith.constant 0.000000e+00 : f32
    %6 = vector.broadcast %cst_5 : f32 to vector<8x96xf32>
    %7 = arith.maximumf %5, %6 : vector<8x96xf32>
    %c0_6 = arith.constant 0 : index
    %c0_7 = arith.constant 0 : index
    %8 = vector.load %arg4[%c0_6, %c0_7] : memref<96x96xf32, #tpu.memory_space<vmem>>, vector<96x96xf32>
    %cst_8 = arith.constant dense<0.000000e+00> : vector<8x96xf32>
    %9 = tpu.matmul %7, %8, %cst_8 {dimension_numbers = #tpu.dot_dimension_numbers<[1], [0], [0], [1], [0, 0, 1, 1], [], []>} : vector<8x96xf32>, vector<96x96xf32>, vector<8x96xf32> -> vector<8x96xf32>
    %c0_9 = arith.constant 0 : index
    %c0_10 = arith.constant 0 : index
    %10 = vector.load %arg5[%c0_9, %c0_10] : memref<1x96xf32, #tpu.memory_space<vmem>>, vector<1x96xf32>
    %11 = vector.broadcast %10 : vector<1x96xf32> to vector<8x96xf32>
    %12 = arith.addf %9, %11 : vector<8x96xf32>
    %cst_11 = arith.constant 0.000000e+00 : f32
    %13 = vector.broadcast %cst_11 : f32 to vector<8x96xf32>
    %14 = arith.maximumf %12, %13 : vector<8x96xf32>
    %c0_12 = arith.constant 0 : index
    %c0_13 = arith.constant 0 : index
    %15 = vector.load %arg6[%c0_12, %c0_13] : memref<96x128xf32, #tpu.memory_space<vmem>>, vector<96x128xf32>
    %cst_14 = arith.constant dense<0.000000e+00> : vector<8x128xf32>
    %16 = tpu.matmul %14, %15, %cst_14 {dimension_numbers = #tpu.dot_dimension_numbers<[1], [0], [0], [1], [0, 0, 1, 1], [], []>} : vector<8x96xf32>, vector<96x128xf32>, vector<8x128xf32> -> vector<8x128xf32>
    %c0_15 = arith.constant 0 : index
    %c0_16 = arith.constant 0 : index
    %17 = vector.load %arg7[%c0_15, %c0_16] : memref<1x128xf32, #tpu.memory_space<vmem>>, vector<1x128xf32>
    %18 = vector.broadcast %17 : vector<1x128xf32> to vector<8x128xf32>
    %19 = arith.addf %16, %18 : vector<8x128xf32>
    %20 = tpu.iota {dimensions = array<i32: 1>} : vector<8x128xi32>
    %c60_i32 = arith.constant 60 : i32
    %21 = vector.broadcast %c60_i32 : i32 to vector<8x128xi32>
    %22 = arith.cmpi sge, %20, %21 : vector<8x128xi32>
    %c70_i32 = arith.constant 70 : i32
    %23 = vector.broadcast %c70_i32 : i32 to vector<8x128xi32>
    %24 = arith.cmpi slt, %20, %23 : vector<8x128xi32>
    %25 = arith.andi %22, %24 : vector<8x128xi1>
    %26 = arith.negf %19 : vector<8x128xf32>
    %27 = math.exp %26 : vector<8x128xf32>
    %cst_17 = arith.constant 1.000000e+00 : f32
    %28 = vector.broadcast %cst_17 : f32 to vector<8x128xf32>
    %29 = arith.addf %28, %27 : vector<8x128xf32>
    %30 = arith.divf %28, %29 : vector<8x128xf32>
    %31 = arith.select %25, %30, %19 : vector<8x128xi1>, vector<8x128xf32>
    %c0_18 = arith.constant 0 : index
    %c0_19 = arith.constant 0 : index
    %32 = vector.load %arg8[%c0_18, %c0_19] : memref<8x128xf32, #tpu.memory_space<vmem>>, vector<8x128xf32>
    tpu.vector_store %arg8[%c0_18, %c0_19], %31 {strides = array<i32>} : memref<8x128xf32, #tpu.memory_space<vmem>>, vector<8x128xf32>,
    return
  }
  func.func @transform_0(%arg0: i32) -> (i32, i32) {
    %c0_i32 = arith.constant 0 : i32
    %c0_i32_0 = arith.constant 0 : i32
    return %arg0, %c0_i32 : i32, i32
  }
  func.func @transform_1(%arg0: i32) -> (i32, i32) {
    %c0_i32 = arith.constant 0 : i32
    %c0_i32_0 = arith.constant 0 : i32
    %c0_i32_1 = arith.constant 0 : i32
    return %c0_i32, %c0_i32_0 : i32, i32
  }
  func.func @transform_2(%arg0: i32) -> (i32, i32) {
    %c0_i32 = arith.constant 0 : i32
    %c0_i32_0 = arith.constant 0 : i32
    %c0_i32_1 = arith.constant 0 : i32
    return %c0_i32, %c0_i32_0 : i32, i32
  }
  func.func @transform_3(%arg0: i32) -> (i32, i32) {
    %c0_i32 = arith.constant 0 : i32
    %c0_i32_0 = arith.constant 0 : i32
    %c0_i32_1 = arith.constant 0 : i32
    return %c0_i32, %c0_i32_0 : i32, i32
  }
  func.func @transform_4(%arg0: i32) -> (i32, i32) {
    %c0_i32 = arith.constant 0 : i32
    %c0_i32_0 = arith.constant 0 : i32
    %c0_i32_1 = arith.constant 0 : i32
    return %c0_i32, %c0_i32_0 : i32, i32
  }
  func.func @transform_5(%arg0: i32) -> (i32, i32) {
    %c0_i32 = arith.constant 0 : i32
    %c0_i32_0 = arith.constant 0 : i32
    %c0_i32_1 = arith.constant 0 : i32
    return %c0_i32, %c0_i32_0 : i32, i32
  }
  func.func @transform_6(%arg0: i32) -> (i32, i32) {
    %c0_i32 = arith.constant 0 : i32
    %c0_i32_0 = arith.constant 0 : i32
    %c0_i32_1 = arith.constant 0 : i32
    return %c0_i32, %c0_i32_0 : i32, i32
  }
  func.func @transform_7(%arg0: i32) -> (i32, i32) {
    %c0_i32 = arith.constant 0 : i32
    %c0_i32_0 = arith.constant 0 : i32
    return %arg0, %c0_i32 : i32, i32
  }
}

</mosaic_0001>

<bundles_post_ra>
// kernel: tpu_custom_call.1
= control target key start
LH: loop header
LB: loop body
LE: loop exit
PB: predicated region body
PF: predicated region fallthrough
CT: control target
= control target key end

     0   :  { %12 = vsyncpa [#allocation3], 0  ;;  %s829_s0 = inlined_call_operand.hbm [shape: f32[8,64], index: 0, kind: input, shape index: {}]   ;;  %s830_s1 = inlined_call_operand.hbm [shape: f32[64,96], index: 1, kind: input, shape index: {}]   ;;  %s831_s2 = inlined_call_operand.vmem [shape: f32[1,96], index: 2, kind: input, shape index: {}]   ;;  %s832_s3 = inlined_call_operand.hbm [shape: f32[96,96], index: 3, kind: input, shape index: {}]   ;;  %s833_s4 = inlined_call_operand.vmem [shape: f32[1,96], index: 4, kind: input, shape index: {}]   ;;  %s834_s5 = inlined_call_operand.hbm [shape: f32[96,128], index: 5, kind: input, shape index: {}]   ;;  %s835_s6 = inlined_call_operand.vmem [shape: f32[1,128], index: 6, kind: input, shape index: {}]   ;;  %s836_s7 = inlined_call_operand.hbm [shape: f32[8,128], index: 7, kind: output, shape index: {}]  }
   0x1   :  { %13 = vsyncpa [#allocation6], 0 }
   0x2   :  { %14 = vsyncpa [#allocation9], 0 }
   0x3   :  { %15 = vsyncpa [#allocation4], 0  ;;  %s682_s24 = smov [#allocation5]   ;;  %s564_s28 = scalar_lea.hbm %s830_s1, 1024 }
   0x4   :  { %s31_s25 = sshll.u32 %s682_s24, 4  ;;  %p565_p0 = scmp.ne.s32.totalorder %s830_s1, %s564_s28  ;;  %s32_s25 = int_to_ptr.vmem [resolvable:$true] %s31_s25 }
   0x5   :  { %p568_p1 = scmp.lt.u32.totalorder %s564_s28, %s830_s1 }
   0x7   :  { %p570_p2 = pnand %p568_p1, %p565_p0 }
   0x9   :  { %573 = shalt.err (!%p570_p2)
}
   0xa   :  { %s574_s10 = scalar_lea.vmem %s32_s25, 1024  ;;  %p579_p4 = scmp.lt.s32.totalorder %s32_s25, %s32_s25 }
   0xb   :  { %p575_p3 = scmp.ne.s32.totalorder %s32_s25, %s574_s10  ;;  %p580_p5 = scmp.lt.s32.totalorder %s574_s10, %s574_s10 }
   0xd   :  { %p581_p6 = por %p580_p5, %p579_p4 }
   0xf   :  { %p582_p7 = pnand %p581_p6, %p575_p3 }
  0x11   :  { %585 = shalt.err (!%p582_p7)
}
  0x12   :  { %s683_s11 = smov 128   ;;  %s684_s12 = smov 8  }
  0x13   :  { %37 = dma.hbm_to_vmem [thread:$0]  %s830_s1, 1024, %s32_s25, [#allocation6], %s683_s11, %s683_s11, %s684_s12  }
  0x14   :  { %s685_s15 = smov [#allocation2]   ;;  %s686_s17 = smov [#allocation7]  }
  0x15   :  { %s22_s16 = sshll.u32 %s685_s15, 4  ;;  %s45_s18 = sshll.u32 %s686_s17, 4  ;;  %s23_s16 = int_to_ptr.vmem [resolvable:$true] %s22_s16  ;;  %s46_s18 = int_to_ptr.vmem [resolvable:$true] %s45_s18 }
  0x16   :  { %s586_s21 = scalar_lea.hbm %s829_s0, 128 }
  0x17   :  { %p587_p8 = scmp.ne.s32.totalorder %s829_s0, %s586_s21  ;;  %p590_p9 = scmp.lt.u32.totalorder %s586_s21, %s829_s0 }
  0x19   :  { %p592_p10 = pnand %p590_p9, %p587_p8 }
  0x1b   :  { %595 = shalt.err (!%p592_p10)
}
  0x1c   :  { %s596_s1 = scalar_lea.vmem %s23_s16, 128  ;;  %p601_p12 = scmp.lt.s32.totalorder %s23_s16, %s23_s16 }
  0x1d   :  { %p597_p11 = scmp.ne.s32.totalorder %s23_s16, %s596_s1  ;;  %p602_p13 = scmp.lt.s32.totalorder %s596_s1, %s596_s1 }
  0x1f   :  { %p603_p0 = por %p602_p13, %p601_p12 }
  0x21   :  { %p604_p1 = pnand %p603_p0, %p597_p11 }
  0x23   :  { %607 = shalt.err (!%p604_p1)
}
  0x24   :  { %25 = dma.hbm_to_vmem [thread:$0]  %s829_s0, 128, %s23_s16, [#allocation3]  }
  0x25   :  { %s608_s30 = scalar_lea.hbm %s832_s3, 1536 }
  0x26   :  { %p609_p2 = scmp.ne.s32.totalorder %s832_s3, %s608_s30  ;;  %p612_p3 = scmp.lt.u32.totalorder %s608_s30, %s832_s3 }
  0x28   :  { %p614_p4 = pnand %p612_p3, %p609_p2 }
  0x2a   :  { %617 = shalt.err (!%p614_p4)
}
  0x2b   :  { %s618_s14 = scalar_lea.vmem %s46_s18, 1536  ;;  %p623_p6 = scmp.lt.s32.totalorder %s46_s18, %s46_s18 }
  0x2c   :  { %p619_p5 = scmp.ne.s32.totalorder %s46_s18, %s618_s14  ;;  %p624_p7 = scmp.lt.s32.totalorder %s618_s14, %s618_s14 }
  0x2e   :  { %p625_p8 = por %p624_p7, %p623_p6 }
  0x30   :  { %p626_p9 = pnand %p625_p8, %p619_p5 }
  0x32   :  { %629 = shalt.err (!%p626_p9)
}
  0x33   :  { %51 = dma.hbm_to_vmem [thread:$0]  %s832_s3, 1536, %s46_s18, [#allocation6], %s683_s11, %s683_s11, %s684_s12  }
  0x34   :  { %s687_s16 = smov [#allocation8]   ;;  %s630_s21 = scalar_lea.hbm %s834_s5, 1536 }
  0x35   :  { %s59_s17 = sshll.u32 %s687_s16, 4  ;;  %p631_p10 = scmp.ne.s32.totalorder %s834_s5, %s630_s21  ;;  %s60_s17 = int_to_ptr.vmem [resolvable:$true] %s59_s17 }
  0x36   :  { %p634_p11 = scmp.lt.u32.totalorder %s630_s21, %s834_s5 }
  0x38   :  { %p636_p12 = pnand %p634_p11, %p631_p10 }
  0x3a   :  { %639 = shalt.err (!%p636_p12)
}
  0x3b   :  { %s640_s1 = scalar_lea.vmem %s60_s17, 1536  ;;  %p645_p0 = scmp.lt.s32.totalorder %s60_s17, %s60_s17 }
  0x3c   :  { %p641_p13 = scmp.ne.s32.totalorder %s60_s17, %s640_s1  ;;  %p646_p1 = scmp.lt.s32.totalorder %s640_s1, %s640_s1 }
  0x3e   :  { %p647_p2 = por %p646_p1, %p645_p0 }
  0x40   :  { %p648_p3 = pnand %p647_p2, %p641_p13 }
  0x42   :  { %651 = shalt.err (!%p648_p3)
}
  0x43   :  { %65 = dma.hbm_to_vmem [thread:$0]  %s834_s5, 1536, %s60_s17, [#allocation9], %s683_s11, %s683_s11, %s684_s12  }
  0x44   :  { %674 = dma.done.wait [#allocation3], 128  }
  0x45   :  { %675 = vsyncadd [#allocation3], 4294967168 }
  0x46   :  { %676 = dma.done.wait [#allocation6], 2560  }
  0x47   :  { %677 = vsyncadd [#allocation6], 4294964736 }
  0x48   :  { %678 = dma.done.wait [#allocation9], 1536  }
  0x49   :  { %679 = vsyncadd [#allocation9], 4294965760  ;;  %v688_v0 = vmov 0.0|0.0   ;;  %vm689_vm0 = vmmov 0   ;;  %v690_v1 = vmov 0.0   ;;  %v81_v2 = vld [vmem:[#allocation5] sm:$0xff] }
  0x4a   :  { %502 = vmatprep.subr.bf16.mxu0 %v688_v0  ;;  %445 = vmatprep.mubr.msk.f32.mxu0 %vm689_vm0, %v690_v1  ;;  %v82_v3 = vld [vmem:[#allocation5 + $0x8] sm:$0xff]  ;;  %v83_v4 = vld [vmem:[#allocation5 + $0x10] sm:$0xff]  ;;  %v84_v6 = vld [vmem:[#allocation5 + $0x18] sm:$0xff]  ;;  %vm96_vm1 = vcmask 523264   ;;  %vm190_vm2 = vcmask 785408  }
  0x4b   :  { %514 = vmatprep.subr.bf16.mxu1 %v688_v0  ;;  %472 = vmatprep.mubr.msk.f32.mxu1 %vm689_vm0, %v690_v1  ;;  %v503_v5 = vpack.c.bf16 %v82_v3, %v81_v2  ;;  %v506_v7 = vpack.c.bf16 %v84_v6, %v83_v4  ;;  %v171_v8 = vld [vmem:[#allocation7] sm:$0xff]  ;;  %v172_v9 = vld [vmem:[#allocation7 + $0x8] sm:$0xff]  ;;  %v173_v10 = vld [vmem:[#allocation7 + $0x10] sm:$0xff]  ;;  %v357_v3 = vlaneseq }
  0x4c   :  { %v85_v11 = vld [vmem:[#allocation5 + $0x20] sm:$0xff]  ;;  %v86_v12 = vld [vmem:[#allocation5 + $0x28] sm:$0xff]  ;;  %v515_v13 = vpack.c.bf16 %v172_v9, %v171_v8  ;;  %v174_v14 = vld [vmem:[#allocation7 + $0x18] sm:$0xff] }
  0x4d   :  { %504 = vmatpush3.bf16.msra.mxu0 %v503_v5  ;;  %v518_v15 = vpack.c.bf16 %v174_v14, %v173_v10  ;;  %v509_v16 = vpack.c.bf16 %v86_v12, %v85_v11  ;;  %v175_v17 = vld [vmem:[#allocation7 + $0x20] sm:$0xff]  ;;  %v176_v18 = vld [vmem:[#allocation7 + $0x28] sm:$0xff]  ;;  %v87_v19 = vld [vmem:[#allocation5 + $0x30] sm:$0xff]  ;;  %v358_v5 = vand.u32 127, %v357_v3 }
  0x4e   :  { %505 = vmatprep.subr.bf16.mxu0 %v688_v0  ;;  %516 = vmatpush3.bf16.msra.mxu1 %v515_v13  ;;  %v88_v20 = vld [vmem:[#allocation5 + $0x38] sm:$0xff]  ;;  %v521_v21 = vpack.c.bf16 %v176_v18, %v175_v17  ;;  %v177_v23 = vld [vmem:[#allocation7 + $0x30] sm:$0xff]  ;;  %v179_v27 = vld [vmem:[#allocation7 + $0x40] sm:$0xff] }
  0x4f   :  { %517 = vmatprep.subr.bf16.mxu1 %v688_v0  ;;  %v512_v22 = vpack.c.bf16 %v88_v20, %v87_v19  ;;  %v178_v24 = vld [vmem:[#allocation7 + $0x38] sm:$0xff]  ;;  %v180_v28 = vld [vmem:[#allocation7 + $0x48] sm:$0xff]  ;;  %v181_v30 = vld [vmem:[#allocation7 + $0x50] sm:$0xff]  ;;  %vm359_vm3 = vcmp.ge.s32.totalorder %v358_v5, 60  ;;  %vm360_vm4 = vcmp.lt.s32.totalorder %v358_v5, 70 }
  0x50   :  { %v524_v25 = vpack.c.bf16 %v178_v24, %v177_v23  ;;  %v80_v26 = vld [vmem:[#allocation2] sm:$0xff]  ;;  %v527_v29 = vpack.c.bf16 %v180_v28, %v179_v27  ;;  %v265_v33 = vld [vmem:[#allocation8] sm:$0xff]  ;;  %v266_v34 = vld [vmem:[#allocation8 + $0x8] sm:$0xff] }
  0x51   :  { %507 = vmatpush3.bf16.msra.mxu0 %v506_v7  ;;  %v182_v31 = vld [vmem:[#allocation7 + $0x58] sm:$0xff]  ;;  %v267_v35 = vld [vmem:[#allocation8 + $0x10] sm:$0xff]  ;;  %v533_v36 = vpack.c.bf16 %v266_v34, %v265_v33  ;;  %v269_v39 = vld [vmem:[#allocation8 + $0x20] sm:$0xff] }
  0x52   :  { %508 = vmatprep.subr.bf16.mxu0 %v688_v0  ;;  %519 = vmatpush3.bf16.msra.mxu1 %v518_v15  ;;  %v530_v32 = vpack.c.bf16 %v182_v31, %v181_v30  ;;  %v268_v37 = vld [vmem:[#allocation8 + $0x18] sm:$0xff]  ;;  %v270_v40 = vld [vmem:[#allocation8 + $0x28] sm:$0xff]  ;;  %v271_v42 = vld [vmem:[#allocation8 + $0x30] sm:$0xff] }
  0x53   :  { %520 = vmatprep.subr.bf16.mxu1 %v688_v0  ;;  %v536_v38 = vpack.c.bf16 %v268_v37, %v267_v35  ;;  %v539_v41 = vpack.c.bf16 %v270_v40, %v269_v39  ;;  %v272_v43 = vld [vmem:[#allocation8 + $0x38] sm:$0xff]  ;;  %v273_v45 = vld [vmem:[#allocation8 + $0x40] sm:$0xff]  ;;  %v274_v46 = vld [vmem:[#allocation8 + $0x48] sm:$0xff] }
  0x54   :  { %v542_v44 = vpack.c.bf16 %v272_v43, %v271_v42  ;;  %v545_v47 = vpack.c.bf16 %v274_v46, %v273_v45  ;;  %v387_v48 = vld [vmem:[%s831_s2] ss:$0 sm:$0xff]  ;;  %v275_v53 = vld [vmem:[#allocation8 + $0x50] sm:$0xff]  ;;  %vm361_vm5 = vmand %vm359_vm3, %vm360_vm4 }
  0x55   :  { %510 = vmatpush3.bf16.msra.mxu0 %v509_v16  ;;  %v276_v54 = vld [vmem:[#allocation8 + $0x58] sm:$0xff] }
  0x56   :  { %511 = vmatprep.subr.bf16.mxu0 %v688_v0  ;;  %522 = vmatpush3.bf16.msra.mxu1 %v521_v21  ;;  %v548_v55 = vpack.c.bf16 %v276_v54, %v275_v53  ;;  %v389_v56 = vld [vmem:[%s833_s4] ss:$0 sm:$0xff]  ;;  %s691_s4 = smov [#allocation10]  }
  0x57   :  { %523 = vmatprep.subr.bf16.mxu1 %v688_v0  ;;  %v391_v61 = vld [vmem:[%s835_s6] ss:$0 sm:$0xff]  ;;  %s376_s28 = sshll.u32 %s691_s4, 4  ;;  %s377_s28 = int_to_ptr.vmem [resolvable:$true] %s376_s28 }
  0x58   :  { %s652_s6 = scalar_lea.vmem %s377_s28, 128  ;;  %p657_p5 = scmp.lt.s32.totalorder %s377_s28, %s377_s28 }
  0x59   :  { %513 = vmatpush3.bf16.msra.mxu0 %v512_v22  ;;  %p653_p4 = scmp.ne.s32.totalorder %s377_s28, %s652_s6  ;;  %p658_p6 = scmp.lt.s32.totalorder %s652_s6, %s652_s6 }
  0x5a   :  { %532 = vmatprep.subr.bf16.mxu0 %v688_v0  ;;  %525 = vmatpush3.bf16.msra.mxu1 %v524_v25 }
  0x5b   :  { %526 = vmatprep.subr.bf16.mxu1 %v688_v0  ;;  %p659_p7 = por %p658_p6, %p657_p5 }
  0x5c   :  { %446 = vmatmul.mubr.msk.f32.vlgmr.msra.gmra.mrb[0].mxu0 %vm96_vm1, %v80_v26 }
  0x5d   :  { %499 = vmatprep.mubr.msk.f32.mxu0 %vm689_vm0, %v690_v1  ;;  %534 = vmatpush3.bf16.msra.mxu0 %v533_v36  ;;  %p660_p8 = pnand %p659_p7, %p653_p4 }
  0x5e   :  { %528 = vmatpush3.bf16.msra.mxu1 %v527_v29  ;;  %535 = vmatprep.subr.bf16.mxu0 %v688_v0 }
  0x5f   :  { %529 = vmatprep.subr.bf16.mxu1 %v688_v0 }
  0x61   :  { %537 = vmatpush3.bf16.msra.mxu0 %v536_v38 }
  0x62   :  { %531 = vmatpush3.bf16.msra.mxu1 %v530_v32  ;;  %538 = vmatprep.subr.bf16.mxu0 %v688_v0 }
  0x65   :  { %540 = vmatpush3.bf16.msra.mxu0 %v539_v41 }
  0x66   :  { %541 = vmatprep.subr.bf16.mxu0 %v688_v0 }
  0x69   :  { %543 = vmatpush3.bf16.msra.mxu0 %v542_v44 }
  0x6a   :  { %544 = vmatprep.subr.bf16.mxu0 %v688_v0 }
  0x6d   :  { %546 = vmatpush3.bf16.msra.mxu0 %v545_v47 }
  0x6e   :  { %547 = vmatprep.subr.bf16.mxu0 %v688_v0 }
  0x71   :  { %549 = vmatpush3.bf16.msra.mxu0 %v548_v55 }
 0x12f   :  { %v166_v49 = vpop.f32.mrb[0].mxu0 }
 0x130   :  { %v167_v50 = vadd.f32 %v387_v48, %v166_v49  ;;  %v447_v51 = vpop.f32.mrb[1].mxu0 }
 0x132   :  { %v170_v52 = vmax.f32 %v167_v50, 0.0 }
 0x134   :  { %473 = vmatmul.mubr.msk.f32.vlgmr.msra.gmra.mrb[0].mxu1 %vm190_vm2, %v170_v52 }
 0x207   :  { %v260_v57 = vpop.f32.mrb[0].mxu1 }
 0x208   :  { %v261_v58 = vadd.f32 %v389_v56, %v260_v57  ;;  %v474_v59 = vpop.f32.mrb[1].mxu1 }
 0x20a   :  { %v264_v60 = vmax.f32 %v261_v58, 0.0 }
 0x20c   :  { %500 = vmatmul.mubr.msk.f32.vlgmr.msra.gmra.mrb[2].mxu0 %vm190_vm2, %v264_v60 }
 0x2df   :  { %v353_v62 = vpop.f32.mrb[2].mxu0 }
 0x2e0   :  { %v354_v63 = vadd.f32 %v391_v61, %v353_v62  ;;  %v501_v0 = vpop.f32.mrb[3].mxu0 }
 0x2e2   :  { %v393_v1 = vmul.f32 -1.442695, %v354_v63 }
 0x2e4   :  { %560 = vpow2.f32 %v393_v1 }
 0x2ee   :  { %v561_v2 = vpop.eup %560 }
 0x2ef   :  { %v365_v4 = vadd.f32 1.0, %v561_v2 }
 0x2f1   :  { %562 = vrcp.f32 %v365_v4 }
 0x2fb   :  { %v563_v6 = vpop.eup %562 }
 0x2fc   :  { %v368_v7 = vsel %vm361_vm5, %v563_v6, %v354_v63 }
 0x2fd   :  { %369 = vst [vmem:[#allocation10] sm:$0xff] %v368_v7 }
 0x2fe   :  { %663 = shalt.err (!%p660_p8)
}
 0x2ff   :  { %s664_s8 = scalar_lea.hbm %s836_s7, 128 }
 0x300   :  { %p665_p9 = scmp.ne.s32.totalorder %s836_s7, %s664_s8  ;;  %p668_p10 = scmp.lt.u32.totalorder %s664_s8, %s836_s7 }
 0x302   :  { %p670_p11 = pnand %p668_p10, %p665_p9 }
 0x304   :  { %673 = shalt.err (!%p670_p11)
}
 0x305   :  { %379 = dma.vmem_to_hbm [thread:$0]  %s377_s28, 128, %s836_s7, [#allocation4]  }
 0x306   :  { %680 = dma.done.wait [#allocation4], 128  }
 0x307   :  { %681 = vsyncadd [#allocation4], 4294967168 }
 0x308   :  { %383 = vsyncpa [#allocation3], 1 }
 0x309   :  { %384 = vsyncpa [#allocation6], 1 }
 0x30a   :  { %385 = vsyncpa [#allocation9], 1 }
 0x30b   :  { %386 = vsyncpa [#allocation4], 1 }

</bundles_post_ra>
